<compile_context>
chip_gen: v5e
topology: v5e:2x2
jax: 0.10.0
libtpu: 0.0.40
codegen_flags: <defaults>
</compile_context>

<pallas_src>
import jax
import jax.numpy as jnp
from jax.experimental import pallas as pl
from jax.experimental.pallas import tpu as pltpu


def _round_up(x, m):
    return ((x + m - 1) // m) * m


def _default_act_dtype():
    """bf16 bias-add/tanh where the VPU/EUP support it (v6e, v7x); f32 elsewhere (v5e)."""
    try:
        kind = jax.devices()[0].device_kind.lower()
    except Exception:
        return jnp.float32
    return jnp.bfloat16 if ("v6" in kind or "v7" in kind) else jnp.float32


def _make_kernel(act_dtype, compute_dtype):
    def kernel(x_ref, w1_ref, b1_ref, w2_ref, b2_ref, w3_ref, b3_ref, o_ref):
        # Transposed layout: x_ref is (obs_dim, TILE_B); batch lives on lanes.
        # Layer 1: Linear + Tanh (f32 MXU accumulation; bias-add/tanh in act_dtype)
        h = jnp.dot(w1_ref[...], x_ref[...], preferred_element_type=jnp.float32)
        h = jnp.tanh(h.astype(act_dtype) + b1_ref[...])
        # Layer 2: Linear + Tanh
        h = jnp.dot(w2_ref[...], h.astype(compute_dtype), preferred_element_type=jnp.float32)
        h = jnp.tanh(h.astype(act_dtype) + b2_ref[...])
        # Layer 3: Linear + Identity (mlp()'s output layer has no activation)
        v = jnp.dot(w3_ref[...], h.astype(compute_dtype), preferred_element_type=jnp.float32)
        o_ref[...] = (v + b3_ref[...]).astype(o_ref.dtype)  # (1, TILE_B): lane-dense store

    return kernel


def mlp_critic_forward(obs, params, *, tile_b=32768, compute_dtype=jnp.bfloat16,
                       act_dtype=None, obs_is_feature_major=False):
    """obs: (B, obs_dim) float32 (or (obs_dim, B) if obs_is_feature_major).
    params: (w1,b1,w2,b2,w3,b3) with W in torch (out,in) layout, b as (out, 1).
    Returns (B,) float32 values, i.e. torch.squeeze(v_net(obs), -1)."""
    w1, b1, w2, b2, w3, b3 = params
    h1, obs_dim = w1.shape
    h2 = w2.shape[0]
    out_dim = w3.shape[0]
    # out[0, :B] below assumes a single-output value head (true for MLPCritic).
    assert out_dim == 1, "MLPCritic value head must have out_dim == 1 (torch.squeeze(-1))."

    if act_dtype is None:
        act_dtype = _default_act_dtype()

    if obs_is_feature_major:
        assert obs.shape[0] == obs_dim
        B = obs.shape[1]
    else:
        assert obs.shape[1] == obs_dim
        B = obs.shape[0]

    # Batch tiling: align to 128 lanes only (never pad up to tile_b); last tile may be
    # partial.  If a single tile would cover the whole batch, split it in two so the
    # "parallel" axis can use both v7x TensorCores.
    Bp = _round_up(B, 128)
    tile_b = _round_up(min(tile_b, Bp), 128)
    if tile_b >= Bp and Bp >= 256:
        tile_b = _round_up(pl.cdiv(Bp, 2), 128)
    n_tiles = pl.cdiv(Bp, tile_b)

    # Layout plumbing (one fused XLA pass): pad batch to Bp, feature-major, cast.
    if obs_is_feature_major:
        x_t = jnp.pad(obs, ((0, 0), (0, Bp - B))).astype(compute_dtype)
    else:
        x_t = jnp.pad(obs, ((0, Bp - B), (0, 0))).T.astype(compute_dtype)

    w1c, w2c, w3c = (w.astype(compute_dtype) for w in (w1, w2, w3))
    b1c, b2c = b1.astype(act_dtype), b2.astype(act_dtype)
    b3c = b3.astype(jnp.float32)

    # Explicit VMEM budget (bytes per batch element), conservative upper bound.
    cw = jnp.dtype(compute_dtype).itemsize
    aw = jnp.dtype(act_dtype).itemsize
    per_elem = (
        2 * cw * obs_dim          # obs tile, double-buffered
        + 2 * 4 * out_dim         # f32 output tile, double-buffered
        + 4 * (h1 + h2)           # f32 matmul accumulators
        + aw * (h1 + h2)          # post-tanh activations
        + cw * (h1 + h2)          # casts fed into the next matmul
    )
    weight_bytes = sum(int(a.size) * a.dtype.itemsize
                       for a in (w1c, b1c, w2c, b2c, w3c, b3c))
    vmem_budget = per_elem * tile_b + weight_bytes + (2 << 20)
    # Raise v5e's 16 MiB default, but stay under v7x's 64 MiB physical VMEM per TC.
    vmem_limit = int(min(max(vmem_budget * 5 // 4, 32 << 20), 64 << 20))

    flops = 2 * Bp * (obs_dim * h1 + h1 * h2 + h2 * out_dim)
    transcendentals = Bp * (h1 + h2)
    bytes_accessed = (int(x_t.size) * x_t.dtype.itemsize + weight_bytes
                      + Bp * out_dim * 4)

    const = lambda i: (0, 0)  # weights/biases stay VMEM-resident across batch tiles

    out = pl.pallas_call(
        _make_kernel(act_dtype, compute_dtype),
        out_shape=jax.ShapeDtypeStruct((out_dim, Bp), jnp.float32),
        grid=(n_tiles,),
        in_specs=[
            # NOTE: if profiling still shows exposed input DMA at very large tile_b,
            # add pipeline_mode=pl.Buffered(3) here (one extra obs buffer of VMEM).
            pl.BlockSpec((obs_dim, tile_b), lambda i: (0, i)),  # obs^T, tiled on lanes
            pl.BlockSpec((h1, obs_dim), const),
            pl.BlockSpec((h1, 1), const),
            pl.BlockSpec((h2, h1), const),
            pl.BlockSpec((h2, 1), const),
            pl.BlockSpec((out_dim, h2), const),
            pl.BlockSpec((out_dim, 1), const),
        ],
        out_specs=pl.BlockSpec((out_dim, tile_b), lambda i: (0, i)),
        compiler_params=pltpu.CompilerParams(
            dimension_semantics=("parallel",),   # batch tiles shard across v7x's 2 TCs
            vmem_limit_bytes=vmem_limit,
        ),
        cost_estimate=pl.CostEstimate(
            flops=flops, transcendentals=transcendentals, bytes_accessed=bytes_accessed
        ),
    )(x_t, w1c, b1c, w2c, b2c, w3c, b3c)

    # torch.squeeze(v_net(obs), -1): (1, Bp) -> (B,)  (padded lanes are discarded)
    return out[0, :B]


def init_params(key, dim_observations, hidden_sizes):
    """Deterministic init mimicking torch.nn.Linear default (uniform +-1/sqrt(fan_in)).
    Weights in torch layout (out_features, in_features); biases as (out, 1)."""
    sizes = [dim_observations] + list(hidden_sizes)
    params = []
    for j in range(len(sizes) - 1):
        fan_in, fan_out = sizes[j], sizes[j + 1]
        key, kw, kb = jax.random.split(key, 3)
        bound = 1.0 / (fan_in ** 0.5)
        w = jax.random.uniform(kw, (fan_out, fan_in), jnp.float32, -bound, bound)
        b = jax.random.uniform(kb, (fan_out, 1), jnp.float32, -bound, bound)
        params += [w, b]
    return tuple(params)


def reference_forward(obs, params):
    """Plain-JAX f32 reference of the same MLP (tanh on all but the last layer)."""
    w1, b1, w2, b2, w3, b3 = params
    h = jnp.tanh(obs @ w1.T + b1[:, 0])
    h = jnp.tanh(h @ w2.T + b2[:, 0])
    v = h @ w3.T + b3[:, 0]
    return jnp.squeeze(v, -1)


if __name__ == "__main__":
    # Small shapes consistent with the module: obs_dim=16, hidden_sizes=[32, 32, 1]
    # (the critic's v_net ends in a width-1 layer so squeeze(-1) gives one value per obs).
    B, dim_observations = 8, 16
    hidden_sizes = [32, 32, 1]

    key = jax.random.PRNGKey(0)
    key, kx = jax.random.split(key)
    obs = jax.random.normal(kx, (B, dim_observations), jnp.float32)
    params = init_params(key, dim_observations, hidden_sizes)

    values = mlp_critic_forward(obs, params)
    values = jax.block_until_ready(values)

    ref = reference_forward(obs, params)
    assert values.shape == (B,), values.shape
    # bf16 matmul inputs (+ bf16 tanh on v6e/v7x) vs pure-f32 reference: widened tolerance.
    assert jnp.allclose(values, ref, atol=5e-2, rtol=5e-2), (values, ref)

    print("KERNEL_OK")
</pallas_src>

<mosaic_0001>
module attributes {stable_mosaic.version = 11 : i64} {
  func.func @kernel(%arg0: i32, %arg1: memref<16x128xbf16, #tpu.memory_space<vmem>>, %arg2: memref<32x16xbf16, #tpu.memory_space<vmem>>, %arg3: memref<32x1xf32, #tpu.memory_space<vmem>>, %arg4: memref<32x32xbf16, #tpu.memory_space<vmem>>, %arg5: memref<32x1xf32, #tpu.memory_space<vmem>>, %arg6: memref<1x32xbf16, #tpu.memory_space<vmem>>, %arg7: memref<1x1xf32, #tpu.memory_space<vmem>>, %arg8: memref<1x128xf32, #tpu.memory_space<vmem>>) attributes {dimension_semantics = [#tpu.dimension_semantics<parallel>], iteration_bounds = array<i64: 1>, scalar_prefetch = 0 : i64, scratch_operands = 0 : i64, tpu.core_type = #tpu.core_type<tc>, window_params = [{transform_indices = @transform_0, window_bounds = array<i64: 16, 128>}, {pipeline_mode = #tpu.pipeline_mode<synchronous>, transform_indices = @transform_1, window_bounds = array<i64: 32, 16>}, {pipeline_mode = #tpu.pipeline_mode<synchronous>, transform_indices = @transform_2, window_bounds = array<i64: 32, 1>}, {pipeline_mode = #tpu.pipeline_mode<synchronous>, transform_indices = @transform_3, window_bounds = array<i64: 32, 32>}, {pipeline_mode = #tpu.pipeline_mode<synchronous>, transform_indices = @transform_4, window_bounds = array<i64: 32, 1>}, {pipeline_mode = #tpu.pipeline_mode<synchronous>, transform_indices = @transform_5, window_bounds = array<i64: 1, 32>}, {pipeline_mode = #tpu.pipeline_mode<synchronous>, transform_indices = @transform_6, window_bounds = array<i64: 1, 1>}, {transform_indices = @transform_7, window_bounds = array<i64: 1, 128>}]} {
    %c0 = arith.constant 0 : index
    %c0_0 = arith.constant 0 : index
    %0 = vector.load %arg2[%c0, %c0_0] : memref<32x16xbf16, #tpu.memory_space<vmem>>, vector<32x16xbf16>
    %c0_1 = arith.constant 0 : index
    %c0_2 = arith.constant 0 : index
    %1 = vector.load %arg1[%c0_1, %c0_2] : memref<16x128xbf16, #tpu.memory_space<vmem>>, vector<16x128xbf16>
    %cst = arith.constant dense<0.000000e+00> : vector<32x128xf32>
    %2 = tpu.matmul %0, %1, %cst {dimension_numbers = #tpu.dot_dimension_numbers<[1], [0], [0], [1], [0, 0, 1, 1], [], []>} : vector<32x16xbf16>, vector<16x128xbf16>, vector<32x128xf32> -> vector<32x128xf32>
    %c0_3 = arith.constant 0 : index
    %c0_4 = arith.constant 0 : index
    %3 = vector.load %arg3[%c0_3, %c0_4] : memref<32x1xf32, #tpu.memory_space<vmem>>, vector<32x1xf32>
    %4 = vector.broadcast %3 : vector<32x1xf32> to vector<32x128xf32>
    %5 = arith.addf %2, %4 : vector<32x128xf32>
    %6 = math.tanh %5 : vector<32x128xf32>
    %c0_5 = arith.constant 0 : index
    %c0_6 = arith.constant 0 : index
    %7 = vector.load %arg4[%c0_5, %c0_6] : memref<32x32xbf16, #tpu.memory_space<vmem>>, vector<32x32xbf16>
    %8 = arith.truncf %6 : vector<32x128xf32> to vector<32x128xbf16>
    %cst_7 = arith.constant dense<0.000000e+00> : vector<32x128xf32>
    %9 = tpu.matmul %7, %8, %cst_7 {dimension_numbers = #tpu.dot_dimension_numbers<[1], [0], [0], [1], [0, 0, 1, 1], [], []>} : vector<32x32xbf16>, vector<32x128xbf16>, vector<32x128xf32> -> vector<32x128xf32>
    %c0_8 = arith.constant 0 : index
    %c0_9 = arith.constant 0 : index
    %10 = vector.load %arg5[%c0_8, %c0_9] : memref<32x1xf32, #tpu.memory_space<vmem>>, vector<32x1xf32>
    %11 = vector.broadcast %10 : vector<32x1xf32> to vector<32x128xf32>
    %12 = arith.addf %9, %11 : vector<32x128xf32>
    %13 = math.tanh %12 : vector<32x128xf32>
    %c0_10 = arith.constant 0 : index
    %c0_11 = arith.constant 0 : index
    %14 = vector.load %arg6[%c0_10, %c0_11] : memref<1x32xbf16, #tpu.memory_space<vmem>>, vector<1x32xbf16>
    %15 = arith.truncf %13 : vector<32x128xf32> to vector<32x128xbf16>
    %cst_12 = arith.constant dense<0.000000e+00> : vector<1x128xf32>
    %16 = tpu.matmul %14, %15, %cst_12 {dimension_numbers = #tpu.dot_dimension_numbers<[1], [0], [0], [1], [0, 0, 1, 1], [], []>} : vector<1x32xbf16>, vector<32x128xbf16>, vector<1x128xf32> -> vector<1x128xf32>
    %c0_13 = arith.constant 0 : index
    %c0_14 = arith.constant 0 : index
    %17 = vector.load %arg7[%c0_13, %c0_14] : memref<1x1xf32, #tpu.memory_space<vmem>>, vector<1x1xf32>
    %18 = vector.broadcast %17 : vector<1x1xf32> to vector<1x128xf32>
    %19 = arith.addf %16, %18 : vector<1x128xf32>
    %c0_15 = arith.constant 0 : index
    %c0_16 = arith.constant 0 : index
    %20 = vector.load %arg8[%c0_15, %c0_16] : memref<1x128xf32, #tpu.memory_space<vmem>>, vector<1x128xf32>
    tpu.vector_store %arg8[%c0_15, %c0_16], %19 {strides = array<i32>} : memref<1x128xf32, #tpu.memory_space<vmem>>, vector<1x128xf32>,
    return
  }
  func.func @transform_0(%arg0: i32) -> (i32, i32) {
    %c0_i32 = arith.constant 0 : i32
    %c0_i32_0 = arith.constant 0 : i32
    return %c0_i32, %arg0 : i32, i32
  }
  func.func @transform_1(%arg0: i32) -> (i32, i32) {
    %c0_i32 = arith.constant 0 : i32
    %c0_i32_0 = arith.constant 0 : i32
    %c0_i32_1 = arith.constant 0 : i32
    return %c0_i32, %c0_i32_0 : i32, i32
  }
  func.func @transform_2(%arg0: i32) -> (i32, i32) {
    %c0_i32 = arith.constant 0 : i32
    %c0_i32_0 = arith.constant 0 : i32
    %c0_i32_1 = arith.constant 0 : i32
    return %c0_i32, %c0_i32_0 : i32, i32
  }
  func.func @transform_3(%arg0: i32) -> (i32, i32) {
    %c0_i32 = arith.constant 0 : i32
    %c0_i32_0 = arith.constant 0 : i32
    %c0_i32_1 = arith.constant 0 : i32
    return %c0_i32, %c0_i32_0 : i32, i32
  }
  func.func @transform_4(%arg0: i32) -> (i32, i32) {
    %c0_i32 = arith.constant 0 : i32
    %c0_i32_0 = arith.constant 0 : i32
    %c0_i32_1 = arith.constant 0 : i32
    return %c0_i32, %c0_i32_0 : i32, i32
  }
  func.func @transform_5(%arg0: i32) -> (i32, i32) {
    %c0_i32 = arith.constant 0 : i32
    %c0_i32_0 = arith.constant 0 : i32
    %c0_i32_1 = arith.constant 0 : i32
    return %c0_i32, %c0_i32_0 : i32, i32
  }
  func.func @transform_6(%arg0: i32) -> (i32, i32) {
    %c0_i32 = arith.constant 0 : i32
    %c0_i32_0 = arith.constant 0 : i32
    %c0_i32_1 = arith.constant 0 : i32
    return %c0_i32, %c0_i32_0 : i32, i32
  }
  func.func @transform_7(%arg0: i32) -> (i32, i32) {
    %c0_i32 = arith.constant 0 : i32
    %c0_i32_0 = arith.constant 0 : i32
    return %c0_i32, %arg0 : i32, i32
  }
}

</mosaic_0001>

<bundles_post_ra>
// kernel: tpu_custom_call.1
= control target key start
LH: loop header
LB: loop body
LE: loop exit
PB: predicated region body
PF: predicated region fallthrough
CT: control target
= control target key end

     0   :  { %s391_s0 = inlined_call_operand.vmem [shape: bf16[16,128], index: 0, kind: input, shape index: {}]   ;;  %s392_s1 = inlined_call_operand.vmem [shape: bf16[32,16], index: 1, kind: input, shape index: {}]   ;;  %s393_s2 = inlined_call_operand.vmem [shape: f32[32,1], index: 2, kind: input, shape index: {}]   ;;  %s394_s3 = inlined_call_operand.vmem [shape: bf16[32,32], index: 3, kind: input, shape index: {}]   ;;  %s395_s4 = inlined_call_operand.vmem [shape: f32[32,1], index: 4, kind: input, shape index: {}]   ;;  %s396_s5 = inlined_call_operand.vmem [shape: bf16[1,32], index: 5, kind: input, shape index: {}]   ;;  %s397_s6 = inlined_call_operand.<no memory space> [shape: f32[1,1], index: 6, kind: input, shape index: {}]   ;;  %s398_s7 = inlined_call_operand.hbm [shape: f32[1,128], index: 7, kind: output, shape index: {}]  }
   0x1   :  { %v12_v0 = vstv %s397_s6 }
   0x2   :  { %13 = vst [vmem:[#allocation2] sm:$0x1] %v12_v0 }
   0x3   :  { %v246_v1 = vld [vmem:[%s391_s0] sm:$0xff]  ;;  %v38_v2 = vld [vmem:[%s393_s2 + $0x10] sm:$0xff]  ;;  %v298_v4 = vmov 0   ;;  %vm76_vm0 = vcmask 130048  }
   0x4   :  { %v244_v3 = vld [vmem:[%s392_s1] sm:$0xff]  ;;  %254 = vset.pattern.permute.xlu1 %v298_v4  ;;  %253 = vset.pattern.permute.xlu0 %v298_v4 }
   0x5   :  { %v36_v5 = vld [vmem:[%s393_s2] sm:$0xff]  ;;  %90 = vmatpush.bf16.msra.mxu0 %v246_v1  ;;  %52 = vperm.xlu0 %253, %v38_v2  }
   0x6   :  { %42 = vperm.xlu1 %254, %v36_v5   ;;  %255 = vset.pattern.permute.xlu2 %v298_v4 }
   0x7   :  { %14 = vsyncpa [#allocation4], 0  ;;  %v39_v6 = vld [vmem:[%s393_s2 + $0x18] sm:$0xff]  ;;  %v37_v7 = vld [vmem:[%s393_s2 + $0x8] sm:$0xff]  ;;  %vm146_vm1 = vcmask 261120   ;;  %s299_s25 = smov [#allocation3]  }
   0x8   :  { %231 = vmatmul.msk.bf16.vlgmr.msra.gmra.mxu0 %vm76_vm0, %v244_v3  ;;  %v112_v8 = vld [vmem:[%s395_s4] sm:$0xff]  ;;  %v113_v9 = vld [vmem:[%s395_s4 + $0x8] sm:$0xff]  ;;  %v114_v13 = vld [vmem:[%s395_s4 + $0x10] sm:$0xff]  ;;  %s208_s26 = sshll.u32 %s299_s25, 4  ;;  %s210_s29 = sshll.u32 %s398_s7, 4  ;;  %s209_s26 = int_to_ptr.vmem [resolvable:$true] %s208_s26  ;;  %s211_s29 = int_to_ptr.hbm [resolvable:$true] %s210_s29 }
   0x9   :  { %v245_v10 = vld [vmem:[%s392_s1 + $0x8] sm:$0xff]  ;;  %128 = vperm.xlu2 %255, %v114_v13   ;;  %v115_v17 = vld [vmem:[%s395_s4 + $0x18] sm:$0xff]  ;;  %v179_v24 = vld [vmem:[#allocation2] sm:$0x1] }
   0xa   :  { %v247_v32 = vld [vmem:[%s394_s3] sm:$0xff]  ;;  %v248_v33 = vld [vmem:[%s394_s3 + $0x8] sm:$0xff] }
   0xb   :  { %v176_v52 = vld [vmem:[%s396_s5] sm:$0x1] }
   0xd   :  { %57 = vperm.xlu0 %253, %v39_v6  }
   0xe   :  { %47 = vperm.xlu1 %254, %v37_v7  }
  0x11   :  { %133 = vperm.xlu2 %255, %v115_v17  }
  0x15   :  { %118 = vperm.xlu0 %253, %v112_v8  }
  0x16   :  { %123 = vperm.xlu1 %254, %v113_v9  }
  0x18   :  { %232 = vmatmul.msk.bf16.gmra.mxu0 %vm76_vm0, %v245_v10 }
  0x19   :  { %182 = vperm.xlu2 %255, %v179_v24  }
  0x63   :  { %v129_v35 = vpop.permute.xlu2 %128 }
  0x6b   :  { %v134_v40 = vpop.permute.xlu2 %133 }
  0x73   :  { %v183_v53 = vpop.permute.xlu2 %182 }
  0x74   :  { %v185_v54 = vperm.slane %v183_v53, 0 }
  0x77   :  { %v53_v15 = vpop.permute.xlu0 %52 }
  0x78   :  { %v43_v14 = vpop.permute.xlu1 %42 }
  0x7f   :  { %v58_v20 = vpop.permute.xlu0 %57 }
  0x80   :  { %v48_v18 = vpop.permute.xlu1 %47 }
  0x85   :  { %v92_v11 = vpop.f32.mrf.mxu0 }
  0x86   :  { %v93_v25 = vadd.f32 %v92_v11, %v43_v14 }
  0x87   :  { %v119_v44 = vpop.permute.xlu0 %118 }
  0x88   :  { %v124_v39 = vpop.permute.xlu1 %123 }
  0x8d   :  { %v94_v12 = vpop.f32.mrf.mxu0 }
  0x8e   :  { %v95_v22 = vadd.f32 %v94_v12, %v48_v18 }
  0x95   :  { %v97_v16 = vpop.f32.mrf.mxu0 }
  0x96   :  { %v98_v19 = vadd.f32 %v97_v16, %v53_v15 }
  0x98   :  { %256 = vtanh.f32 %v98_v19 }
  0x9d   :  { %v99_v21 = vpop.f32.mrf.mxu0 }
  0x9e   :  { %v100_v23 = vadd.f32 %v99_v21, %v58_v20  ;;  %v257_v26 = vpop.eup %256 }
  0xa0   :  { %258 = vtanh.f32 %v100_v23 }
  0xa1   :  { %260 = vtanh.f32 %v95_v22 }
  0xa2   :  { %262 = vtanh.f32 %v93_v25 }
  0xa6   :  { %v259_v27 = vpop.eup %258 }
  0xa7   :  { %v111_v28 = vpack.c.bf16 %v259_v27, %v257_v26  ;;  %v261_v29 = vpop.eup %260 }
  0xa8   :  { %v263_v30 = vpop.eup %262 }
  0xa9   :  { %159 = vmatpush.bf16.msra.mxu1 %v111_v28  ;;  %249 = vmatpush.bf16.msra.mxu3 %v111_v28  ;;  %v110_v31 = vpack.c.bf16 %v261_v29, %v263_v30 }
  0xad   :  { %160 = vmatpush.bf16.msra.mxu1 %v110_v31  ;;  %250 = vmatpush.bf16.msra.mxu3 %v110_v31 }
  0xb0   :  { %241 = vmatmul.msk.bf16.vlgmr.msra.gmra.mxu1 %vm146_vm1, %v247_v32  ;;  %242 = vmatmul.msk.bf16.vlgmr.msra.gmra.mxu3 %vm146_vm1, %v248_v33 }
 0x12d   :  { %v162_v34 = vpop.f32.mrf.mxu1 }
 0x12e   :  { %v163_v45 = vadd.f32 %v162_v34, %v119_v44 }
 0x133   :  { %v167_v36 = vpop.f32.mrf.mxu3 }
 0x134   :  { %v168_v37 = vadd.f32 %v167_v36, %v129_v35 }
 0x135   :  { %v164_v38 = vpop.f32.mrf.mxu1 }
 0x136   :  { %v165_v42 = vadd.f32 %v164_v38, %v124_v39  ;;  %264 = vtanh.f32 %v168_v37 }
 0x13b   :  { %v169_v41 = vpop.f32.mrf.mxu3 }
 0x13c   :  { %v170_v43 = vadd.f32 %v169_v41, %v134_v40  ;;  %v265_v46 = vpop.eup %264 }
 0x13e   :  { %266 = vtanh.f32 %v170_v43 }
 0x13f   :  { %268 = vtanh.f32 %v165_v42 }
 0x140   :  { %270 = vtanh.f32 %v163_v45 }
 0x144   :  { %v267_v47 = vpop.eup %266 }
 0x145   :  { %v178_v48 = vpack.c.bf16 %v267_v47, %v265_v46  ;;  %v269_v49 = vpop.eup %268 }
 0x146   :  { %v271_v50 = vpop.eup %270 }
 0x147   :  { %195 = vmatpush.bf16.msra.mxu2 %v178_v48  ;;  %v177_v51 = vpack.c.bf16 %v269_v49, %v271_v50 }
 0x14b   :  { %196 = vmatpush.bf16.msra.mxu2 %v177_v51 }
 0x14e   :  { %243 = vmatmul.msk.bf16.vlgmr.msra.gmra.mxu2 %vm146_vm1, %v176_v52 }
 0x1d1   :  { %v198_v55 = vpop.f32.mrf.mxu2 }
 0x1d2   :  { %v199_v56 = vadd.f32 %v198_v55, %v185_v54 }
 0x1d4   :  { %202 = vst [vmem:[#allocation3] sm:$0x1] %v199_v56 }
 0x1d5   :  { %213 = dma.vmem_to_hbm [thread:$0]  %s209_s26, 16, %s211_s29, [#allocation4]  }
 0x1d9   :  { %v200_v57 = vpop.f32.mrf.mxu2 }
 0x1da   :  { %296 = dma.done.wait [#allocation4], 16  }
 0x1db   :  { %297 = vsyncadd [#allocation4], 4294967280 }
 0x1dc   :  { %218 = vsyncpa [#allocation4], 1 }

</bundles_post_ra>
